<compile_context>
chip_gen: v6e
topology: v6e:2x2x1
jax: 0.10.0
libtpu: 0.0.40
codegen_flags: <defaults>
</compile_context>

<pallas_src>
import jax
import jax.numpy as jnp
from jax.experimental import pallas as pl
from jax.experimental.pallas import tpu as pltpu

_OUT_LANES = 128  # lane-dense output block width (one full vreg of lanes)


def _round_up(x, m):
    return ((x + m - 1) // m) * m


def _ncp_kernel(x_ref, w1_ref, b1_ref, gamma_ref, beta_ref, w2_ref, b2_ref,
                o_ref):
    # x tile: (TM, H). Cast to the matmul dtype carried by W1 (bf16 by
    # default); accumulation stays f32 via preferred_element_type.
    x = x_ref[...]
    w1 = w1_ref[...]
    h = jnp.dot(x.astype(w1.dtype), w1, preferred_element_type=jnp.float32)

    # Bias + ReLU (f32, VPU).
    h = jnp.maximum(h + b1_ref[...], 0.0)

    # BertLayerNorm (eps = 1e-12 inside the sqrt), all in f32.
    u = jnp.mean(h, axis=-1, keepdims=True)
    d = h - u
    s = jnp.mean(d * d, axis=-1, keepdims=True)
    hn = d * jax.lax.rsqrt(s + 1e-12)
    hn = hn * gamma_ref[...] + beta_ref[...]

    # Dropout -> identity (eval semantics).
    # TODO(synk): training-mode dropout would need pltpu.prng_seed /
    # pltpu.prng_random_bits; omitted for inference.

    # Linear(H, 1): VPU multiply + lane (XLU) reduction against the (1, H) w2
    # row — avoids an N=1 MXU matmul and the awkward (H,1) VMEM layout.
    row = jnp.sum(hn * w2_ref[...], axis=-1, keepdims=True) + b2_ref[...]  # (TM,1)

    # Lane-dense store: replicate the per-row scalar across 128 lanes so the
    # store is an unmasked full-width vst; the wrapper slices column 0.
    o_ref[...] = jnp.broadcast_to(row, o_ref.shape).astype(o_ref.dtype)


def next_candidate_prediction(x, params, *, tm=256,
                              matmul_dtype=jnp.bfloat16,
                              vmem_limit_bytes=None):
    """x: (B, S, H) float32 -> (B, S, 1) float32.

    tm: row tile (sweep this; multiple of 8, ideally 128/256 for the MXU).
    matmul_dtype: dtype fed to the HxH MXU matmul (f32 accumulation either way).
    vmem_limit_bytes: optional scoped-VMEM override; useful on v7x (64 MiB)
        for large H + large tm, since W1 is double-buffered by default even
        though its index_map is constant.
    """
    w1, b1, gamma, beta, w2, b2 = params
    B, S, H = x.shape
    rows = B * S
    xf = x.reshape(rows, H)

    # Row tiling: clamp for tiny inputs, keep a multiple of 8 (f32 sublanes),
    # zero-pad rows instead of asserting divisibility.
    tm = max(8, min(tm, _round_up(rows, 8)))
    tm = _round_up(tm, 8)
    padded_rows = _round_up(rows, tm)
    if padded_rows != rows:
        xf = jnp.pad(xf, ((0, padded_rows - rows), (0, 0)))

    w1c = w1.astype(matmul_dtype)     # halves W1 DMA + VMEM footprint for bf16
    w2_row = w2.reshape(1, H)         # (H,1) -> (1,H) row for the VPU reduce

    grid = (padded_rows // tm,)

    cost = pl.CostEstimate(
        flops=2 * padded_rows * H * (H + 1),
        transcendentals=padded_rows,                       # rsqrt per row
        bytes_accessed=(padded_rows * H * xf.dtype.itemsize
                        + H * H * w1c.dtype.itemsize
                        + 4 * H * 4 + 4
                        + padded_rows * _OUT_LANES * 4),
    )

    out = pl.pallas_call(
        _ncp_kernel,
        out_shape=jax.ShapeDtypeStruct((padded_rows, _OUT_LANES), jnp.float32),
        grid=grid,
        in_specs=[
            pl.BlockSpec((tm, H), lambda i: (i, 0)),    # x row tile
            pl.BlockSpec((H, H), lambda i: (0, 0)),     # W1 (VMEM-resident)
            pl.BlockSpec((1, H), lambda i: (0, 0)),     # b1
            pl.BlockSpec((1, H), lambda i: (0, 0)),     # gamma
            pl.BlockSpec((1, H), lambda i: (0, 0)),     # beta
            pl.BlockSpec((1, H), lambda i: (0, 0)),     # w2 row
            pl.BlockSpec((1, 1), lambda i: (0, 0)),     # b2
        ],
        out_specs=pl.BlockSpec((tm, _OUT_LANES), lambda i: (i, 0)),
        compiler_params=pltpu.CompilerParams(
            dimension_semantics=("parallel",),
            vmem_limit_bytes=vmem_limit_bytes),
        cost_estimate=cost,
    )(xf, w1c, b1, gamma, beta, w2_row, b2)

    return out[:rows, :1].reshape(B, S, 1)


def _reference(x, params):
    w1, b1, gamma, beta, w2, b2 = params
    h = jnp.maximum(x @ w1 + b1[0], 0.0)
    u = jnp.mean(h, axis=-1, keepdims=True)
    s = jnp.mean((h - u) ** 2, axis=-1, keepdims=True)
    hn = (h - u) / jnp.sqrt(s + 1e-12) * gamma[0] + beta[0]
    return hn @ w2 + b2[0]


def init_params(key, hidden):
    k1, k2, k3, k4 = jax.random.split(key, 4)
    scale = 1.0 / jnp.sqrt(hidden)
    w1 = jax.random.uniform(k1, (hidden, hidden), jnp.float32, -scale, scale)
    b1 = jax.random.uniform(k2, (1, hidden), jnp.float32, -scale, scale)
    gamma = jnp.ones((1, hidden), jnp.float32)
    beta = jnp.zeros((1, hidden), jnp.float32)
    w2 = jax.random.uniform(k3, (hidden, 1), jnp.float32, -scale, scale)
    b2 = jax.random.uniform(k4, (1, 1), jnp.float32, -scale, scale)
    return (w1, b1, gamma, beta, w2, b2)


if __name__ == "__main__":
    batch, seq, hidden = 2, 8, 32
    key = jax.random.PRNGKey(0)
    kx, kp = jax.random.split(key)
    x = jax.random.normal(kx, (batch, seq, hidden), jnp.float32)
    params = init_params(kp, hidden)

    ref = _reference(x, params)

    # Exact-dtype path: tight check against the f32 reference.
    out_f32 = next_candidate_prediction(x, params, matmul_dtype=jnp.float32)
    out_f32 = jax.block_until_ready(out_f32)
    assert out_f32.shape == (batch, seq, 1)
    assert jnp.allclose(out_f32, ref, atol=1e-4, rtol=1e-4), \
        "f32 mismatch vs reference"

    # Default path (bf16 MXU inputs, f32 accumulation): looser tolerance.
    out_bf16 = next_candidate_prediction(x, params)
    out_bf16 = jax.block_until_ready(out_bf16)
    assert out_bf16.shape == (batch, seq, 1)
    assert jnp.allclose(out_bf16, ref, atol=2e-2, rtol=2e-2), \
        "bf16 mismatch vs reference"

    print("KERNEL_OK")
</pallas_src>

<mosaic_0001>
module attributes {stable_mosaic.version = 11 : i64} {
  func.func @_ncp_kernel(%arg0: i32, %arg1: memref<16x32xf32, #tpu.memory_space<vmem>>, %arg2: memref<32x32xf32, #tpu.memory_space<vmem>>, %arg3: memref<1x32xf32, #tpu.memory_space<vmem>>, %arg4: memref<1x32xf32, #tpu.memory_space<vmem>>, %arg5: memref<1x32xf32, #tpu.memory_space<vmem>>, %arg6: memref<1x32xf32, #tpu.memory_space<vmem>>, %arg7: memref<1x1xf32, #tpu.memory_space<vmem>>, %arg8: memref<16x128xf32, #tpu.memory_space<vmem>>) attributes {dimension_semantics = [#tpu.dimension_semantics<parallel>], iteration_bounds = array<i64: 1>, scalar_prefetch = 0 : i64, scratch_operands = 0 : i64, tpu.core_type = #tpu.core_type<tc>, window_params = [{transform_indices = @transform_0, window_bounds = array<i64: 16, 32>}, {pipeline_mode = #tpu.pipeline_mode<synchronous>, transform_indices = @transform_1, window_bounds = array<i64: 32, 32>}, {pipeline_mode = #tpu.pipeline_mode<synchronous>, transform_indices = @transform_2, window_bounds = array<i64: 1, 32>}, {pipeline_mode = #tpu.pipeline_mode<synchronous>, transform_indices = @transform_3, window_bounds = array<i64: 1, 32>}, {pipeline_mode = #tpu.pipeline_mode<synchronous>, transform_indices = @transform_4, window_bounds = array<i64: 1, 32>}, {pipeline_mode = #tpu.pipeline_mode<synchronous>, transform_indices = @transform_5, window_bounds = array<i64: 1, 32>}, {pipeline_mode = #tpu.pipeline_mode<synchronous>, transform_indices = @transform_6, window_bounds = array<i64: 1, 1>}, {transform_indices = @transform_7, window_bounds = array<i64: 16, 128>}]} {
    %c0 = arith.constant 0 : index
    %c0_0 = arith.constant 0 : index
    %0 = vector.load %arg1[%c0, %c0_0] : memref<16x32xf32, #tpu.memory_space<vmem>>, vector<16x32xf32>
    %c0_1 = arith.constant 0 : index
    %c0_2 = arith.constant 0 : index
    %1 = vector.load %arg2[%c0_1, %c0_2] : memref<32x32xf32, #tpu.memory_space<vmem>>, vector<32x32xf32>
    %cst = arith.constant dense<0.000000e+00> : vector<16x32xf32>
    %2 = tpu.matmul %0, %1, %cst {dimension_numbers = #tpu.dot_dimension_numbers<[1], [0], [0], [1], [0, 0, 1, 1], [], []>} : vector<16x32xf32>, vector<32x32xf32>, vector<16x32xf32> -> vector<16x32xf32>
    %c0_3 = arith.constant 0 : index
    %c0_4 = arith.constant 0 : index
    %3 = vector.load %arg3[%c0_3, %c0_4] : memref<1x32xf32, #tpu.memory_space<vmem>>, vector<1x32xf32>
    %4 = vector.broadcast %3 : vector<1x32xf32> to vector<16x32xf32>
    %5 = arith.addf %2, %4 : vector<16x32xf32>
    %cst_5 = arith.constant 0.000000e+00 : f32
    %6 = vector.broadcast %cst_5 : f32 to vector<16x32xf32>
    %7 = arith.maximumf %5, %6 : vector<16x32xf32>
    %cst_6 = arith.constant dense<0.000000e+00> : vector<16xf32>
    %8 = vector.multi_reduction <add>, %7, %cst_6 [1] : vector<16x32xf32> to vector<16xf32>
    %9 = vector.shape_cast %8 : vector<16xf32> to vector<16x1xf32>
    %cst_7 = arith.constant 3.200000e+01 : f32
    %10 = vector.broadcast %cst_7 : f32 to vector<16x1xf32>
    %11 = arith.divf %9, %10 : vector<16x1xf32>
    %12 = vector.broadcast %11 : vector<16x1xf32> to vector<16x32xf32>
    %13 = arith.subf %7, %12 : vector<16x32xf32>
    %14 = arith.mulf %13, %13 : vector<16x32xf32>
    %cst_8 = arith.constant dense<0.000000e+00> : vector<16xf32>
    %15 = vector.multi_reduction <add>, %14, %cst_8 [1] : vector<16x32xf32> to vector<16xf32>
    %16 = vector.shape_cast %15 : vector<16xf32> to vector<16x1xf32>
    %cst_9 = arith.constant 3.200000e+01 : f32
    %17 = vector.broadcast %cst_9 : f32 to vector<16x1xf32>
    %18 = arith.divf %16, %17 : vector<16x1xf32>
    %cst_10 = arith.constant 9.99999996E-13 : f32
    %19 = vector.broadcast %cst_10 : f32 to vector<16x1xf32>
    %20 = arith.addf %18, %19 : vector<16x1xf32>
    %21 = math.rsqrt %20 : vector<16x1xf32>
    %22 = vector.broadcast %21 : vector<16x1xf32> to vector<16x32xf32>
    %23 = arith.mulf %13, %22 : vector<16x32xf32>
    %c0_11 = arith.constant 0 : index
    %c0_12 = arith.constant 0 : index
    %24 = vector.load %arg4[%c0_11, %c0_12] : memref<1x32xf32, #tpu.memory_space<vmem>>, vector<1x32xf32>
    %25 = vector.broadcast %24 : vector<1x32xf32> to vector<16x32xf32>
    %26 = arith.mulf %23, %25 : vector<16x32xf32>
    %c0_13 = arith.constant 0 : index
    %c0_14 = arith.constant 0 : index
    %27 = vector.load %arg5[%c0_13, %c0_14] : memref<1x32xf32, #tpu.memory_space<vmem>>, vector<1x32xf32>
    %28 = vector.broadcast %27 : vector<1x32xf32> to vector<16x32xf32>
    %29 = arith.addf %26, %28 : vector<16x32xf32>
    %c0_15 = arith.constant 0 : index
    %c0_16 = arith.constant 0 : index
    %30 = vector.load %arg6[%c0_15, %c0_16] : memref<1x32xf32, #tpu.memory_space<vmem>>, vector<1x32xf32>
    %31 = vector.broadcast %30 : vector<1x32xf32> to vector<16x32xf32>
    %32 = arith.mulf %29, %31 : vector<16x32xf32>
    %cst_17 = arith.constant dense<0.000000e+00> : vector<16xf32>
    %33 = vector.multi_reduction <add>, %32, %cst_17 [1] : vector<16x32xf32> to vector<16xf32>
    %34 = vector.shape_cast %33 : vector<16xf32> to vector<16x1xf32>
    %c0_18 = arith.constant 0 : index
    %c0_19 = arith.constant 0 : index
    %35 = vector.load %arg7[%c0_18, %c0_19] : memref<1x1xf32, #tpu.memory_space<vmem>>, vector<1x1xf32>
    %36 = vector.broadcast %35 : vector<1x1xf32> to vector<16x1xf32>
    %37 = arith.addf %34, %36 : vector<16x1xf32>
    %38 = vector.shape_cast %37 : vector<16x1xf32> to vector<16x1xf32>
    %39 = vector.broadcast %38 : vector<16x1xf32> to vector<16x128xf32>
    %c0_20 = arith.constant 0 : index
    %c0_21 = arith.constant 0 : index
    %40 = vector.load %arg8[%c0_20, %c0_21] : memref<16x128xf32, #tpu.memory_space<vmem>>, vector<16x128xf32>
    tpu.vector_store %arg8[%c0_20, %c0_21], %39 {strides = array<i32>} : memref<16x128xf32, #tpu.memory_space<vmem>>, vector<16x128xf32>,
    return
  }
  func.func @transform_0(%arg0: i32) -> (i32, i32) {
    %c0_i32 = arith.constant 0 : i32
    %c0_i32_0 = arith.constant 0 : i32
    return %arg0, %c0_i32 : i32, i32
  }
  func.func @transform_1(%arg0: i32) -> (i32, i32) {
    %c0_i32 = arith.constant 0 : i32
    %c0_i32_0 = arith.constant 0 : i32
    %c0_i32_1 = arith.constant 0 : i32
    return %c0_i32, %c0_i32_0 : i32, i32
  }
  func.func @transform_2(%arg0: i32) -> (i32, i32) {
    %c0_i32 = arith.constant 0 : i32
    %c0_i32_0 = arith.constant 0 : i32
    %c0_i32_1 = arith.constant 0 : i32
    return %c0_i32, %c0_i32_0 : i32, i32
  }
  func.func @transform_3(%arg0: i32) -> (i32, i32) {
    %c0_i32 = arith.constant 0 : i32
    %c0_i32_0 = arith.constant 0 : i32
    %c0_i32_1 = arith.constant 0 : i32
    return %c0_i32, %c0_i32_0 : i32, i32
  }
  func.func @transform_4(%arg0: i32) -> (i32, i32) {
    %c0_i32 = arith.constant 0 : i32
    %c0_i32_0 = arith.constant 0 : i32
    %c0_i32_1 = arith.constant 0 : i32
    return %c0_i32, %c0_i32_0 : i32, i32
  }
  func.func @transform_5(%arg0: i32) -> (i32, i32) {
    %c0_i32 = arith.constant 0 : i32
    %c0_i32_0 = arith.constant 0 : i32
    %c0_i32_1 = arith.constant 0 : i32
    return %c0_i32, %c0_i32_0 : i32, i32
  }
  func.func @transform_6(%arg0: i32) -> (i32, i32) {
    %c0_i32 = arith.constant 0 : i32
    %c0_i32_0 = arith.constant 0 : i32
    %c0_i32_1 = arith.constant 0 : i32
    return %c0_i32, %c0_i32_0 : i32, i32
  }
  func.func @transform_7(%arg0: i32) -> (i32, i32) {
    %c0_i32 = arith.constant 0 : i32
    %c0_i32_0 = arith.constant 0 : i32
    return %arg0, %c0_i32 : i32, i32
  }
}

</mosaic_0001>

<bundles_post_ra>
// kernel: tpu_custom_call.1
= control target key start
LH: loop header
LB: loop body
LE: loop exit
PB: predicated region body
PF: predicated region fallthrough
CT: control target
= control target key end

     0   :  { %s442_s0 = inlined_call_operand.hbm [shape: f32[16,32], index: 0, kind: input, shape index: {}]   ;;  %s443_s1 = inlined_call_operand.hbm [shape: f32[32,32], index: 1, kind: input, shape index: {}]   ;;  %s444_s2 = inlined_call_operand.vmem [shape: f32[1,32], index: 2, kind: input, shape index: {}]   ;;  %s445_s3 = inlined_call_operand.vmem [shape: f32[1,32], index: 3, kind: input, shape index: {}]   ;;  %s446_s4 = inlined_call_operand.vmem [shape: f32[1,32], index: 4, kind: input, shape index: {}]   ;;  %s447_s5 = inlined_call_operand.vmem [shape: f32[1,32], index: 5, kind: input, shape index: {}]   ;;  %s448_s6 = inlined_call_operand.<no memory space> [shape: f32[1,1], index: 6, kind: input, shape index: {}]   ;;  %s449_s7 = inlined_call_operand.hbm [shape: f32[16,128], index: 7, kind: output, shape index: {}]  }
   0x1   :  { %v12_v0 = vstv %s448_s6 }
   0x2   :  { %13 = vst [vmem:[#allocation2] sm:$0x1] %v12_v0 }
   0x3   :  { %14 = vsyncpa [#allocation4], 0 }
   0x4   :  { %15 = vsyncpa [#allocation7], 0 }
   0x5   :  { %16 = vsyncpa [#allocation5], 0  ;;  %s355_s26 = smov [#allocation3]  }
   0x6   :  { %s22_s27 = sshll.u32 %s355_s26, 4  ;;  %s23_s27 = int_to_ptr.vmem [resolvable:$true] %s22_s27 }
   0x7   :  { %s297_s28 = scalar_lea.vmem %s23_s27, 256  ;;  %p302_p1 = scmp.lt.s32.totalorder %s23_s27, %s23_s27 }
   0x8   :  { %p298_p0 = scmp.ne.s32.totalorder %s23_s27, %s297_s28  ;;  %p303_p2 = scmp.lt.s32.totalorder %s297_s28, %s297_s28 }
   0xa   :  { %p304_p3 = por %p303_p2, %p302_p1 }
   0xc   :  { %p305_p4 = pnand %p304_p3, %p298_p0 }
   0xe   :  { %308 = shalt.err (!%p305_p4)
}
   0xf   :  { %s356_s29 = smov 128   ;;  %s357_s30 = smov 8  }
  0x10   :  { %28 = dma.hbm_to_vmem [thread:$0]  %s442_s0, 256, %s23_s27, [#allocation4], %s356_s29, %s356_s29, %s357_s30  }
  0x11   :  { %s358_s9 = smov [#allocation6]  }
  0x12   :  { %s34_s10 = sshll.u32 %s358_s9, 4  ;;  %s35_s10 = int_to_ptr.vmem [resolvable:$true] %s34_s10 }
  0x13   :  { %s317_s11 = scalar_lea.vmem %s35_s10, 512  ;;  %p322_p6 = scmp.lt.s32.totalorder %s35_s10, %s35_s10 }
  0x14   :  { %p318_p5 = scmp.ne.s32.totalorder %s35_s10, %s317_s11  ;;  %p323_p7 = scmp.lt.s32.totalorder %s317_s11, %s317_s11 }
  0x16   :  { %p324_p8 = por %p323_p7, %p322_p6 }
  0x18   :  { %p325_p9 = pnand %p324_p8, %p318_p5 }
  0x1a   :  { %328 = shalt.err (!%p325_p9)
}
  0x1b   :  { %40 = dma.hbm_to_vmem [thread:$0]  %s443_s1, 512, %s35_s10, [#allocation7], %s356_s29, %s356_s29, %s357_s30  }
  0x1c   :  { %349 = dma.done.wait [#allocation4], 256  }
  0x1d   :  { %350 = vsyncadd [#allocation4], 4294967040 }
  0x1e   :  { %351 = dma.done.wait [#allocation7], 512  }
  0x1f   :  { %352 = vsyncadd [#allocation7], 4294966784  ;;  %vm70_vm0 = vcmask 261120   ;;  %v62_v1 = vld [vmem:[#allocation6 + $0x18] sm:$0xff]  ;;  %v61_v2 = vld [vmem:[#allocation6 + $0x10] sm:$0xff]  ;;  %v359_v47 = vmov 0  }
  0x20   :  { %266 = vmatprep.subr.mxu0 %v62_v1  ;;  %v57_v3 = vld [vmem:[#allocation3] sm:$0xff]  ;;  %v60_v4 = vld [vmem:[#allocation6 + $0x8] sm:$0xff]  ;;  %v59_v5 = vld [vmem:[#allocation6] sm:$0xff]  ;;  %283 = vset.pattern.permute.xlu0 %v359_v47 }
  0x21   :  { %267 = vmatpush3.msra.mxu0 %v62_v1  ;;  %274 = vmatprep.mubr.msk.f32.mxu0 %vm70_vm0, %v57_v3  ;;  %v58_v6 = vld [vmem:[#allocation3 + $0x8] sm:$0xff]  ;;  %v253_v8 = vld [vmem:[%s444_s2] ss:$0 sm:$0xff] }
  0x22   :  { %268 = vmatprep.subr.mxu0 %v61_v2  ;;  %v256_v33 = vld [vmem:[%s445_s3] ss:$0 sm:$0xff]  ;;  %284 = vset.pattern.permute.xlu1 %v359_v47  ;;  %s360_s3 = smov [#allocation8]  }
  0x23   :  { %269 = vmatpush3.msra.mxu0 %v61_v2  ;;  %v257_v35 = vld [vmem:[%s446_s4] ss:$0 sm:$0xff]  ;;  %s240_s4 = sshll.u32 %s360_s3, 4  ;;  %s241_s4 = int_to_ptr.vmem [resolvable:$true] %s240_s4 }
  0x24   :  { %270 = vmatprep.subr.mxu0 %v60_v4  ;;  %v258_v38 = vld [vmem:[%s447_s5] ss:$0 sm:$0xff]  ;;  %s329_s5 = scalar_lea.vmem %s241_s4, 256  ;;  %p334_p11 = scmp.lt.s32.totalorder %s241_s4, %s241_s4 }
  0x25   :  { %271 = vmatpush3.msra.mxu0 %v60_v4  ;;  %v259_v48 = vld [vmem:[#allocation2] ss:$0 sm:$0xff]  ;;  %p330_p10 = scmp.ne.s32.totalorder %s241_s4, %s329_s5  ;;  %p335_p12 = scmp.lt.s32.totalorder %s329_s5, %s329_s5 }
  0x26   :  { %272 = vmatprep.subr.mxu0 %v59_v5 }
  0x27   :  { %273 = vmatpush3.msra.mxu0 %v59_v5  ;;  %p336_p13 = por %p335_p12, %p334_p11 }
  0x28   :  { %275 = vmatmul.mubr.msk.f32.vlgmr.msra.gmra.mxu0 %vm70_vm0, %v58_v6 }
  0x29   :  { %p337_p0 = pnand %p336_p13, %p330_p10 }
  0xe8   :  { %v276_v7 = vpop.f32.mrf.mxu0 }
  0xe9   :  { %v149_v10 = vadd.f32 %v276_v7, %v253_v8 }
  0xea   :  { %v143_v9 = vpop.f32.mrf.mxu0 }
  0xeb   :  { %v144_v11 = vadd.f32 %v253_v8, %v143_v9  ;;  %v153_v13 = vmax.f32 %v149_v10, 0.0 }
  0xed   :  { %v152_v12 = vmax.f32 %v144_v11, 0.0  ;;  %v157_v15 = vsel %vm70_vm0, %v153_v13, 0.0 }
  0xef   :  { %v154_v14 = vsel %vm70_vm0, %v152_v12, 0.0 }
  0xf0   :  { %155 = vadd.xlane.f32.xlu0 %v154_v14 }
  0xf4   :  { %158 = vadd.xlane.f32.xlu0 %v157_v15 }
 0x179   :  { %v156_v16 = vpop.xlane.xlu0 %155 }
 0x17a   :  { %v161_v17 = vmul.f32 0.03125, %v156_v16 }
 0x17c   :  { %v163_v18 = vsub.f32 %v152_v12, %v161_v17 }
 0x17d   :  { %v159_v19 = vpop.xlane.xlu0 %158 }
 0x17e   :  { %v162_v20 = vmul.f32 0.03125, %v159_v19  ;;  %v165_v21 = vmul.f32 %v163_v18, %v163_v18 }
 0x180   :  { %v164_v22 = vsub.f32 %v153_v13, %v162_v20  ;;  %v167_v23 = vsel %vm70_vm0, %v165_v21, 0.0 }
 0x181   :  { %168 = vadd.xlane.f32.xlu1 %v167_v23 }
 0x182   :  { %v166_v24 = vmul.f32 %v164_v22, %v164_v22 }
 0x184   :  { %v170_v25 = vsel %vm70_vm0, %v166_v24, 0.0 }
 0x185   :  { %171 = vadd.xlane.f32.xlu1 %v170_v25 }
 0x20a   :  { %v169_v26 = vpop.xlane.xlu1 %168 }
 0x20b   :  { %v173_v27 = vmul.f32 0.03125, %v169_v26 }
 0x20d   :  { %v175_v28 = vadd.f32 1e-12, %v173_v27 }
 0x20e   :  { %v172_v29 = vpop.xlane.xlu1 %171 }
 0x20f   :  { %285 = vrsqrt.f32 %v175_v28  ;;  %v174_v30 = vmul.f32 0.03125, %v172_v29 }
 0x211   :  { %v176_v31 = vadd.f32 1e-12, %v174_v30 }
 0x213   :  { %287 = vrsqrt.f32 %v176_v31 }
 0x21c   :  { %v286_v32 = vpop.eup %285 }
 0x21d   :  { %v179_v34 = vmul.f32 %v286_v32, %v163_v18 }
 0x21f   :  { %v188_v36 = vmul.f32 %v256_v33, %v179_v34 }
 0x220   :  { %v288_v37 = vpop.eup %287 }
 0x221   :  { %v197_v39 = vadd.f32 %v257_v35, %v188_v36  ;;  %v180_v40 = vmul.f32 %v288_v37, %v164_v22 }
 0x223   :  { %v206_v41 = vmul.f32 %v258_v38, %v197_v39  ;;  %v189_v42 = vmul.f32 %v256_v33, %v180_v40 }
 0x225   :  { %v208_v43 = vsel %vm70_vm0, %v206_v41, 0.0  ;;  %v198_v44 = vadd.f32 %v257_v35, %v189_v42 }
 0x226   :  { %209 = vadd.xlane.f32.xlu0 %v208_v43 }
 0x227   :  { %v207_v45 = vmul.f32 %v258_v38, %v198_v44 }
 0x229   :  { %v211_v46 = vsel %vm70_vm0, %v207_v45, 0.0 }
 0x22a   :  { %212 = vadd.xlane.f32.xlu1 %v211_v46 }
 0x2af   :  { %v210_v49 = vpop.xlane.xlu0 %209 }
 0x2b0   :  { %v221_v50 = vadd.f32 %v259_v48, %v210_v49 }
 0x2b2   :  { %225 = vperm.xlu0 %283, %v221_v50  }
 0x2b3   :  { %v213_v51 = vpop.xlane.xlu1 %212 }
 0x2b4   :  { %v222_v52 = vadd.f32 %v259_v48, %v213_v51 }
 0x2b6   :  { %230 = vperm.xlu1 %284, %v222_v52  }
 0x32d   :  { %v226_v53 = vpop.permute.xlu0 %225 }
 0x32e   :  { %233 = vst [vmem:[#allocation8] sm:$0xff] %v226_v53 }
 0x331   :  { %v231_v54 = vpop.permute.xlu1 %230 }
 0x332   :  { %234 = vst [vmem:[#allocation8 + $0x8] sm:$0xff] %v231_v54 }
 0x333   :  { %340 = shalt.err (!%p337_p0)
}
 0x334   :  { %246 = dma.vmem_to_hbm [thread:$0]  %s241_s4, 256, %s449_s7, [#allocation5], %s356_s29, %s356_s29, %s357_s30  }
 0x335   :  { %353 = dma.done.wait [#allocation5], 256  }
 0x336   :  { %354 = vsyncadd [#allocation5], 4294967040 }
 0x337   :  { %250 = vsyncpa [#allocation4], 1 }
 0x338   :  { %251 = vsyncpa [#allocation7], 1 }
 0x339   :  { %252 = vsyncpa [#allocation5], 1 }

</bundles_post_ra>
